<compile_context>
chip_gen: v6e
topology: v6e:2x2x1
jax: 0.10.0
libtpu: 0.0.40
codegen_flags: <defaults>
</compile_context>

<pallas_src>
import jax
import jax.numpy as jnp
from jax.experimental import pallas as pl
from jax.experimental.pallas import tpu as pltpu


_K_TILE_THRESHOLD = 2048     # only tile the contraction above this many columns
_SMALL_BYTES = 4 << 20       # single-block fast path if everything fits in ~4 MiB


def _round_up(x: int, m: int) -> int:
    return ((x + m - 1) // m) * m


def _vmem_budget_bytes() -> int:
    """Per-core VMEM Mosaic may use: generation-aware (v7x = 64 MiB) with headroom."""
    try:
        cap = int(pltpu.get_tpu_info().vmem_capacity_bytes)
    except Exception:
        cap = 64 << 20  # conservative fallback = v7x per-core VMEM
    return max(16 << 20, (cap * 3) // 4)


# ----------------------------------------------------------------------- kernels
def _fused_kernel(x0_ref, x1_ref, w_ref, b_ref, o_ref):
    """relu/relu -> collapsed add chain -> matmul -> +bias, full-K block."""
    r0 = jnp.maximum(x0_ref[...], 0.0)
    r1 = jnp.maximum(x1_ref[...], 0.0)
    a3 = 2.0 * ((r0 + r1) + r1)          # bit-identical to (a0+r1) + (r1+a0)
    acc = jnp.dot(a3, w_ref[...], preferred_element_type=jnp.float32)
    o_ref[...] = (acc + b_ref[...]).astype(o_ref.dtype)


def _fused_kernel_kacc(x0_ref, x1_ref, w_ref, b_ref, o_ref, acc_ref):
    """Same fusion with a K grid axis (last, 'arbitrary') and an f32 accumulator."""
    k = pl.program_id(2)

    @pl.when(k == 0)
    def _():
        acc_ref[...] = jnp.zeros_like(acc_ref)

    r0 = jnp.maximum(x0_ref[...], 0.0)
    r1 = jnp.maximum(x1_ref[...], 0.0)
    a3 = 2.0 * ((r0 + r1) + r1)
    acc_ref[...] += jnp.dot(a3, w_ref[...], preferred_element_type=jnp.float32)

    @pl.when(k == pl.num_programs(2) - 1)
    def _():
        o_ref[...] = (acc_ref[...] + b_ref[...]).astype(o_ref.dtype)


# ------------------------------------------------------------------- param prep
def prepare_params(weight, bias):
    """One-time parameter prep (hoisted out of the per-call hot path).

    PyTorch Linear weight is (out_features, in_features); transpose to (K, N).
    Lane padding is applied only when it pays:
      * N padded to a multiple of 128 only when N > 128 and ragged (lane-dense
        stores for wide outputs); small/exact N stays untouched.
      * K padded to a multiple of 128 only when the contraction will be K-tiled
        (K > _K_TILE_THRESHOLD).
    Zero padding is exact: padded K rows multiply zeroed activation columns,
    padded N columns are sliced off after the kernel.
    """
    N, K = weight.shape
    Np = _round_up(N, 128) if (N > 128 and N % 128 != 0) else N
    Kp = _round_up(K, 128) if (K > _K_TILE_THRESHOLD and K % 128 != 0) else K

    w_t = weight.T
    if (Kp, Np) != (K, N):
        w_t = jnp.zeros((Kp, Np), weight.dtype).at[:K, :N].set(w_t)
    if Np != N:
        b2d = jnp.zeros((1, Np), bias.dtype).at[0, :N].set(bias)
    else:
        b2d = bias.reshape(1, N)
    return w_t, b2d


# ---------------------------------------------------------------------- forward
def sample_module1_forward(x0, x1, w_t, b2d, *, n_out):
    """x0, x1: (M, K) float32; w_t: (Kp, Np) pre-transposed (maybe padded); b2d: (1, Np)."""
    M, K = x0.shape
    Kp, Np = w_t.shape
    itemsize = x0.dtype.itemsize
    budget = _vmem_budget_bytes()

    # ------------------------------------------------------------------ fast path
    # Whole problem in a single grid step with full-extent blocks: no activation
    # padding, no N padding, no output slice -- the pallas_call is the only op.
    total_bytes = itemsize * (2 * M * K + Kp * Np + Np + M * Np)
    if Kp == K and Np == n_out and total_bytes <= _SMALL_BYTES:
        return pl.pallas_call(
            _fused_kernel,
            out_shape=jax.ShapeDtypeStruct((M, Np), x0.dtype),
            grid_spec=pltpu.PrefetchScalarGridSpec(
                num_scalar_prefetch=0,
                grid=(1,),
                in_specs=[
                    pl.BlockSpec((M, K), lambda i: (0, 0)),
                    pl.BlockSpec((M, K), lambda i: (0, 0)),
                    pl.BlockSpec((K, Np), lambda i: (0, 0)),
                    pl.BlockSpec((1, Np), lambda i: (0, 0)),
                ],
                out_specs=pl.BlockSpec((M, Np), lambda i: (0, 0)),
            ),
            compiler_params=pltpu.CompilerParams(
                dimension_semantics=("arbitrary",),
                vmem_limit_bytes=int(min(32 << 20, budget)),
            ),
            cost_estimate=pl.CostEstimate(
                flops=2 * M * K * Np + 5 * M * K,
                transcendentals=0,
                bytes_accessed=total_bytes,
            ),
        )(x0, x1, w_t, b2d)

    # --------------------------------------------------------------- general path
    # Pad activation K only when the weight K was padded for K-tiling (rare).
    if Kp != K:
        x0 = jnp.pad(x0, ((0, 0), (0, Kp - K)))
        x1 = jnp.pad(x1, ((0, 0), (0, Kp - K)))

    # K tiling only for large contractions; tk must be a 128-multiple divisor of Kp.
    if Kp > _K_TILE_THRESHOLD:
        tk = next(t for t in (1024, 512, 256, 128) if Kp % t == 0)
    else:
        tk = Kp
    k_tiles = Kp // tk

    # N tile: full extent when small, else a lane-dense divisor of Np.
    if Np <= 512:
        tn = Np
    else:
        tn = next(t for t in (512, 384, 256, 128) if Np % t == 0)
    n_tiles = Np // tn

    # M tile: large rows to fill the 256-wide MXU; pl.cdiv grid handles a partial
    # last block so awkward M (e.g. 130) does not double the padded work.
    tm = min(256, _round_up(M, 8))

    def _footprint(tm_):
        elems = (2 * 2 * tm_ * tk                      # x0, x1 (double-buffered)
                 + 2 * tk * tn                         # weight (double-buffered)
                 + 2 * tn                              # bias
                 + 2 * tm_ * tn                        # output (double-buffered)
                 + (tm_ * tn if k_tiles > 1 else 0))   # accumulator scratch
        return itemsize * elems

    while _footprint(tm) > budget and tm > 8:
        tm = max(8, tm // 2)
    m_tiles = pl.cdiv(M, tm)

    if k_tiles == 1:
        # Keep the LARGER operand resident across the inner grid axis so it is
        # DMA'd from HBM exactly once; the smaller operand is re-streamed.
        if 2 * M * Kp >= Kp * Np:
            grid = (m_tiles, n_tiles)                  # activations resident over j
            x_spec = pl.BlockSpec((tm, Kp), lambda i, j: (i, 0))
            w_spec = pl.BlockSpec((Kp, tn), lambda i, j: (0, j))
            b_spec = pl.BlockSpec((1, tn), lambda i, j: (0, j))
            o_spec = pl.BlockSpec((tm, tn), lambda i, j: (i, j))
        else:
            grid = (n_tiles, m_tiles)                  # weight/bias resident over i
            x_spec = pl.BlockSpec((tm, Kp), lambda j, i: (i, 0))
            # Resident operands: the second pipeline buffer is pure wasted VMEM.
            w_spec = pl.BlockSpec((Kp, tn), lambda j, i: (0, j),
                                  pipeline_mode=pl.Buffered(1))
            b_spec = pl.BlockSpec((1, tn), lambda j, i: (0, j),
                                  pipeline_mode=pl.Buffered(1))
            o_spec = pl.BlockSpec((tm, tn), lambda j, i: (i, j))
        kernel = _fused_kernel
        scratch = []
        dims = ("parallel", "parallel")
    else:
        grid = (m_tiles, n_tiles, k_tiles)
        x_spec = pl.BlockSpec((tm, tk), lambda i, j, k: (i, k))
        w_spec = pl.BlockSpec((tk, tn), lambda i, j, k: (k, j))
        b_spec = pl.BlockSpec((1, tn), lambda i, j, k: (0, j))
        o_spec = pl.BlockSpec((tm, tn), lambda i, j, k: (i, j))
        kernel = _fused_kernel_kacc
        scratch = [pltpu.VMEM((tm, tn), jnp.float32)]
        dims = ("parallel", "parallel", "arbitrary")

    vmem_limit = int(min(budget, max(32 << 20, 2 * _footprint(tm))))
    flops = 2 * M * Kp * Np + 5 * M * Kp
    bytes_accessed = itemsize * (2 * M * Kp + Kp * Np + Np + M * Np)

    out = pl.pallas_call(
        kernel,
        out_shape=jax.ShapeDtypeStruct((M, Np), x0.dtype),
        grid_spec=pltpu.PrefetchScalarGridSpec(
            num_scalar_prefetch=0,
            grid=grid,
            in_specs=[x_spec, x_spec, w_spec, b_spec],
            out_specs=o_spec,
            scratch_shapes=scratch,
        ),
        compiler_params=pltpu.CompilerParams(
            dimension_semantics=dims,
            vmem_limit_bytes=vmem_limit,
        ),
        cost_estimate=pl.CostEstimate(
            flops=flops, transcendentals=0, bytes_accessed=bytes_accessed
        ),
    )(x0, x1, w_t, b2d)

    return out[:, :n_out] if Np != n_out else out


# -------------------------------------------------------------------- reference
def reference_forward(x0, x1, weight, bias):
    r0 = jnp.maximum(x0, 0.0)
    r1 = jnp.maximum(x1, 0.0)
    a0 = r0 + r1
    a1 = a0 + r1
    a2 = r1 + a0
    a3 = a1 + a2
    return a3 @ weight.T + bias


if __name__ == "__main__":
    # Small shapes consistent with the module: batch=8, in_features=32, out_features=32.
    batch, in_features, out_features = 8, 32, 32

    key = jax.random.PRNGKey(0)
    k0, k1, kw, kb = jax.random.split(key, 4)

    x0 = jax.random.normal(k0, (batch, in_features), dtype=jnp.float32)
    x1 = jax.random.normal(k1, (batch, in_features), dtype=jnp.float32)

    # Deterministic parameter init (mimic nn.Linear default uniform bound 1/sqrt(fan_in)).
    bound = 1.0 / (in_features ** 0.5)
    weight = jax.random.uniform(
        kw, (out_features, in_features), minval=-bound, maxval=bound, dtype=jnp.float32
    )
    bias = jax.random.uniform(
        kb, (out_features,), minval=-bound, maxval=bound, dtype=jnp.float32
    )

    # One-time parameter prep (transpose; lane padding only when it pays), hoisted
    # out of the per-call hot path.
    w_t, b2d = prepare_params(weight, bias)

    out = sample_module1_forward(x0, x1, w_t, b2d, n_out=out_features)
    out = jax.block_until_ready(out)

    ref = reference_forward(x0, x1, weight, bias)
    assert out.shape == (batch, out_features)
    assert jnp.allclose(out, ref, atol=1e-5, rtol=1e-5)

    print("KERNEL_OK")
</pallas_src>

<mosaic_0001>
module attributes {stable_mosaic.version = 11 : i64} {
  func.func @_fused_kernel(%arg0: i32, %arg1: memref<8x32xf32, #tpu.memory_space<vmem>>, %arg2: memref<8x32xf32, #tpu.memory_space<vmem>>, %arg3: memref<32x32xf32, #tpu.memory_space<vmem>>, %arg4: memref<1x32xf32, #tpu.memory_space<vmem>>, %arg5: memref<8x32xf32, #tpu.memory_space<vmem>>) attributes {dimension_semantics = [#tpu.dimension_semantics<arbitrary>], iteration_bounds = array<i64: 1>, scalar_prefetch = 0 : i64, scratch_operands = 0 : i64, tpu.core_type = #tpu.core_type<tc>, window_params = [{pipeline_mode = #tpu.pipeline_mode<synchronous>, transform_indices = @transform_0, window_bounds = array<i64: 8, 32>}, {pipeline_mode = #tpu.pipeline_mode<synchronous>, transform_indices = @transform_1, window_bounds = array<i64: 8, 32>}, {pipeline_mode = #tpu.pipeline_mode<synchronous>, transform_indices = @transform_2, window_bounds = array<i64: 32, 32>}, {pipeline_mode = #tpu.pipeline_mode<synchronous>, transform_indices = @transform_3, window_bounds = array<i64: 1, 32>}, {pipeline_mode = #tpu.pipeline_mode<synchronous>, transform_indices = @transform_4, window_bounds = array<i64: 8, 32>}]} {
    %c0 = arith.constant 0 : index
    %c0_0 = arith.constant 0 : index
    %0 = vector.load %arg1[%c0, %c0_0] : memref<8x32xf32, #tpu.memory_space<vmem>>, vector<8x32xf32>
    %cst = arith.constant 0.000000e+00 : f32
    %1 = vector.broadcast %cst : f32 to vector<8x32xf32>
    %2 = arith.maximumf %0, %1 : vector<8x32xf32>
    %c0_1 = arith.constant 0 : index
    %c0_2 = arith.constant 0 : index
    %3 = vector.load %arg2[%c0_1, %c0_2] : memref<8x32xf32, #tpu.memory_space<vmem>>, vector<8x32xf32>
    %cst_3 = arith.constant 0.000000e+00 : f32
    %4 = vector.broadcast %cst_3 : f32 to vector<8x32xf32>
    %5 = arith.maximumf %3, %4 : vector<8x32xf32>
    %6 = arith.addf %2, %5 : vector<8x32xf32>
    %7 = arith.addf %6, %5 : vector<8x32xf32>
    %cst_4 = arith.constant 2.000000e+00 : f32
    %8 = vector.broadcast %cst_4 : f32 to vector<8x32xf32>
    %9 = arith.mulf %8, %7 : vector<8x32xf32>
    %c0_5 = arith.constant 0 : index
    %c0_6 = arith.constant 0 : index
    %10 = vector.load %arg3[%c0_5, %c0_6] : memref<32x32xf32, #tpu.memory_space<vmem>>, vector<32x32xf32>
    %cst_7 = arith.constant dense<0.000000e+00> : vector<8x32xf32>
    %11 = tpu.matmul %9, %10, %cst_7 {dimension_numbers = #tpu.dot_dimension_numbers<[1], [0], [0], [1], [0, 0, 1, 1], [], []>} : vector<8x32xf32>, vector<32x32xf32>, vector<8x32xf32> -> vector<8x32xf32>
    %c0_8 = arith.constant 0 : index
    %c0_9 = arith.constant 0 : index
    %12 = vector.load %arg4[%c0_8, %c0_9] : memref<1x32xf32, #tpu.memory_space<vmem>>, vector<1x32xf32>
    %13 = vector.broadcast %12 : vector<1x32xf32> to vector<8x32xf32>
    %14 = arith.addf %11, %13 : vector<8x32xf32>
    %c0_10 = arith.constant 0 : index
    %c0_11 = arith.constant 0 : index
    %15 = vector.load %arg5[%c0_10, %c0_11] : memref<8x32xf32, #tpu.memory_space<vmem>>, vector<8x32xf32>
    tpu.vector_store %arg5[%c0_10, %c0_11], %14 {strides = array<i32>} : memref<8x32xf32, #tpu.memory_space<vmem>>, vector<8x32xf32>,
    return
  }
  func.func @transform_0(%arg0: i32) -> (i32, i32) {
    %c0_i32 = arith.constant 0 : i32
    %c0_i32_0 = arith.constant 0 : i32
    %c0_i32_1 = arith.constant 0 : i32
    return %c0_i32, %c0_i32_0 : i32, i32
  }
  func.func @transform_1(%arg0: i32) -> (i32, i32) {
    %c0_i32 = arith.constant 0 : i32
    %c0_i32_0 = arith.constant 0 : i32
    %c0_i32_1 = arith.constant 0 : i32
    return %c0_i32, %c0_i32_0 : i32, i32
  }
  func.func @transform_2(%arg0: i32) -> (i32, i32) {
    %c0_i32 = arith.constant 0 : i32
    %c0_i32_0 = arith.constant 0 : i32
    %c0_i32_1 = arith.constant 0 : i32
    return %c0_i32, %c0_i32_0 : i32, i32
  }
  func.func @transform_3(%arg0: i32) -> (i32, i32) {
    %c0_i32 = arith.constant 0 : i32
    %c0_i32_0 = arith.constant 0 : i32
    %c0_i32_1 = arith.constant 0 : i32
    return %c0_i32, %c0_i32_0 : i32, i32
  }
  func.func @transform_4(%arg0: i32) -> (i32, i32) {
    %c0_i32 = arith.constant 0 : i32
    %c0_i32_0 = arith.constant 0 : i32
    %c0_i32_1 = arith.constant 0 : i32
    return %c0_i32, %c0_i32_0 : i32, i32
  }
}

</mosaic_0001>

<bundles_post_ra>
// kernel: tpu_custom_call.1
= control target key start
LH: loop header
LB: loop body
LE: loop exit
PB: predicated region body
PF: predicated region fallthrough
CT: control target
= control target key end

     0   :  { %9 = vsyncpa [#allocation3], 0  ;;  %s324_s0 = inlined_call_operand.hbm [shape: f32[8,32], index: 0, kind: input, shape index: {}]   ;;  %s325_s1 = inlined_call_operand.hbm [shape: f32[8,32], index: 1, kind: input, shape index: {}]   ;;  %s326_s2 = inlined_call_operand.hbm [shape: f32[32,32], index: 2, kind: input, shape index: {}]   ;;  %s327_s3 = inlined_call_operand.vmem [shape: f32[1,32], index: 3, kind: input, shape index: {}]   ;;  %s328_s4 = inlined_call_operand.hbm [shape: f32[8,32], index: 4, kind: output, shape index: {}]  }
   0x1   :  { %10 = vsyncpa [#allocation6], 0 }
   0x2   :  { %11 = vsyncpa [#allocation4], 0  ;;  %s276_s15 = smov [#allocation5]   ;;  %s277_s17 = smov [#allocation2]  }
   0x3   :  { %s28_s16 = sshll.u32 %s276_s15, 4  ;;  %s18_s18 = sshll.u32 %s277_s17, 4  ;;  %s29_s16 = int_to_ptr.vmem [resolvable:$true] %s28_s16  ;;  %s19_s18 = int_to_ptr.vmem [resolvable:$true] %s18_s18 }
   0x4   :  { %s198_s19 = scalar_lea.vmem %s29_s16, 128  ;;  %p203_p1 = scmp.lt.s32.totalorder %s29_s16, %s29_s16 }
   0x5   :  { %p199_p0 = scmp.ne.s32.totalorder %s29_s16, %s198_s19  ;;  %p204_p2 = scmp.lt.s32.totalorder %s198_s19, %s198_s19 }
   0x7   :  { %p205_p3 = por %p204_p2, %p203_p1 }
   0x9   :  { %p206_p4 = pnand %p205_p3, %p199_p0 }
   0xb   :  { %209 = shalt.err (!%p206_p4)
}
   0xc   :  { %31 = dma.hbm_to_vmem [thread:$0]  %s325_s1, 128, %s29_s16, [#allocation6]  }
   0xd   :  { %s218_s22 = scalar_lea.vmem %s19_s18, 128  ;;  %p223_p6 = scmp.lt.s32.totalorder %s19_s18, %s19_s18 }
   0xe   :  { %p219_p5 = scmp.ne.s32.totalorder %s19_s18, %s218_s22  ;;  %p224_p7 = scmp.lt.s32.totalorder %s218_s22, %s218_s22 }
  0x10   :  { %p225_p8 = por %p224_p7, %p223_p6 }
  0x12   :  { %p226_p9 = pnand %p225_p8, %p219_p5 }
  0x14   :  { %229 = shalt.err (!%p226_p9)
}
  0x15   :  { %21 = dma.hbm_to_vmem [thread:$0]  %s324_s0, 128, %s19_s18, [#allocation3]  }
  0x16   :  { %s278_s25 = smov [#allocation7]  }
  0x17   :  { %s37_s26 = sshll.u32 %s278_s25, 4  ;;  %s38_s26 = int_to_ptr.vmem [resolvable:$true] %s37_s26 }
  0x18   :  { %s238_s27 = scalar_lea.vmem %s38_s26, 512  ;;  %p243_p11 = scmp.lt.s32.totalorder %s38_s26, %s38_s26 }
  0x19   :  { %p239_p10 = scmp.ne.s32.totalorder %s38_s26, %s238_s27  ;;  %p244_p12 = scmp.lt.s32.totalorder %s238_s27, %s238_s27 }
  0x1b   :  { %p245_p13 = por %p244_p12, %p243_p11 }
  0x1d   :  { %p246_p0 = pnand %p245_p13, %p239_p10 }
  0x1f   :  { %249 = shalt.err (!%p246_p0)
}
  0x20   :  { %s279_s1 = smov 128   ;;  %s280_s28 = smov 8  }
  0x21   :  { %43 = dma.hbm_to_vmem [thread:$0]  %s326_s2, 512, %s38_s26, [#allocation6], %s279_s1, %s279_s1, %s280_s28  }
  0x22   :  { %270 = dma.done.wait [#allocation3], 128  }
  0x23   :  { %271 = vsyncadd [#allocation3], 4294967168 }
  0x24   :  { %272 = dma.done.wait [#allocation6], 640  }
  0x25   :  { %273 = vsyncadd [#allocation6], 4294966656  ;;  %v281_v0 = vmov 0.0   ;;  %vm282_vm0 = vmmov 0   ;;  %v65_v1 = vld [vmem:[#allocation7 + $0x18] sm:$0xff]  ;;  %v64_v2 = vld [vmem:[#allocation7 + $0x10] sm:$0xff] }
  0x26   :  { %171 = vmatprep.subr.mxu0 %v281_v0  ;;  %179 = vmatprep.mubr.msk.f32.mxu0 %vm282_vm0, %v281_v0  ;;  %v55_v3 = vld [vmem:[#allocation2] sm:$0xff]  ;;  %v57_v4 = vld [vmem:[#allocation5] sm:$0xff]  ;;  %v63_v5 = vld [vmem:[#allocation7 + $0x8] sm:$0xff]  ;;  %vm73_vm1 = vcmask 261120   ;;  %s283_s5 = smov [#allocation8]  }
  0x27   :  { %172 = vmatpush3.msra.mxu0 %v65_v1  ;;  %v56_v6 = vmax.f32 %v55_v3, 0.0  ;;  %v58_v7 = vmax.f32 %v57_v4, 0.0  ;;  %v62_v8 = vld [vmem:[#allocation7] sm:$0xff]  ;;  %v164_v12 = vld [vmem:[%s327_s3] ss:$0 sm:$0xff]  ;;  %s154_s6 = sshll.u32 %s283_s5, 4  ;;  %s155_s6 = int_to_ptr.vmem [resolvable:$true] %s154_s6 }
  0x28   :  { %173 = vmatprep.subr.mxu0 %v281_v0  ;;  %s250_s7 = scalar_lea.vmem %s155_s6, 128  ;;  %p255_p2 = scmp.lt.s32.totalorder %s155_s6, %s155_s6 }
  0x29   :  { %174 = vmatpush3.msra.mxu0 %v64_v2  ;;  %v59_v9 = vadd.f32 %v58_v7, %v56_v6  ;;  %p251_p1 = scmp.ne.s32.totalorder %s155_s6, %s250_s7  ;;  %p256_p3 = scmp.lt.s32.totalorder %s250_s7, %s250_s7 }
  0x2a   :  { %175 = vmatprep.subr.mxu0 %v281_v0 }
  0x2b   :  { %176 = vmatpush3.msra.mxu0 %v63_v5  ;;  %v60_v10 = vadd.f32 %v59_v9, %v58_v7  ;;  %p257_p4 = por %p256_p3, %p255_p2 }
  0x2c   :  { %177 = vmatprep.subr.mxu0 %v281_v0 }
  0x2d   :  { %178 = vmatpush3.msra.mxu0 %v62_v8  ;;  %v61_v11 = vmul.f32 2.0, %v60_v10  ;;  %p258_p5 = pnand %p257_p4, %p251_p1 }
  0x2f   :  { %180 = vmatmul.mubr.msk.f32.vlgmr.msra.gmra.mxu0 %vm73_vm1, %v61_v11 }
  0xef   :  { %v143_v13 = vpop.f32.mrf.mxu0 }
  0xf0   :  { %v144_v14 = vadd.f32 %v164_v12, %v143_v13 }
  0xf1   :  { %v181_v15 = vpop.f32.mrf.mxu0 }
  0xf2   :  { %147 = vst.msk [vmem:[#allocation8] sm:$0xff] %vm73_vm1, %v144_v14 }
  0xf3   :  { %261 = shalt.err (!%p258_p5)
}
  0xf4   :  { %157 = dma.vmem_to_hbm [thread:$0]  %s155_s6, 128, %s328_s4, [#allocation4]  }
  0xf5   :  { %274 = dma.done.wait [#allocation4], 128  }
  0xf6   :  { %275 = vsyncadd [#allocation4], 4294967168 }
  0xf7   :  { %161 = vsyncpa [#allocation3], 1 }
  0xf8   :  { %162 = vsyncpa [#allocation6], 1 }
  0xf9   :  { %163 = vsyncpa [#allocation4], 1 }

</bundles_post_ra>
